<compile_context>
chip_gen: v5e
topology: v5e:2x2
jax: 0.10.0
libtpu: 0.0.40
codegen_flags: <defaults>
</compile_context>

<pallas_src>
import functools
import math

import jax
import jax.numpy as jnp
import jax.scipy.special as jsp_special
from jax import lax
from jax.experimental import pallas as pl
from jax.experimental.pallas import tpu as pltpu

_LANES = 128
_HALF_LOG_2PI = 0.5 * math.log(2.0 * math.pi)


def _cdiv(a: int, b: int) -> int:
    return -(-a // b)


def _lgamma(x):
    """Elementwise log-gamma for x > 0 (lax.lgamma has no Mosaic lowering).

    lgamma(x) = lgamma(x+4) - log(x (x+1) (x+2) (x+3)) with Stirling's series at
    z = x + 4 >= 4. Truncation error of the 3-term series at z=4 is ~4e-8 and the
    approx reciprocal perturbs a <=1/48 correction term by ~2^-12 -> both well
    below f32 noise for this loss.
    """
    p0 = x * (x + 1.0) * (x + 2.0) * (x + 3.0)
    z = x + 4.0
    zi = pl.reciprocal(z, approx=True)          # EUP slot (otherwise idle)
    zi2 = zi * zi
    series = zi * (1.0 / 12.0 + zi2 * (-1.0 / 360.0 + zi2 * (1.0 / 1260.0)))
    return (z - 0.5) * jnp.log(z) - z + _HALF_LOG_2PI + series - jnp.log(p0)


def _nb_kernel(preds_ref, theta_ref, truth_ref, out_ref, acc_ref, *,
               n_rows, tile_rows, steps, fold, scale_factor, eps):
    c = pl.program_id(0)          # optional core-split axis ("parallel")
    k = pl.program_id(1)          # streaming reduction axis ("arbitrary")

    @pl.when(k == 0)
    def _():
        acc_ref[...] = jnp.zeros_like(acc_ref)

    y_pred = preds_ref[...].astype(jnp.float32)
    if scale_factor != 1.0:
        y_pred = y_pred * scale_factor
    theta = jnp.minimum(theta_ref[...].astype(jnp.float32), 1e6)
    y_true = truth_ref[...].astype(jnp.float32)

    th_eps = theta + eps
    t1 = _lgamma(th_eps) + _lgamma(y_true + 1.0) - _lgamma(y_true + th_eps)

    # log1p(y_pred/(theta+eps)) == log(theta+eps+y_pred) - log(theta+eps):
    # divide-free and reuses lt (precision loss only for y_pred << theta, same
    # order as the previous log(1+u) form; acceptable for NB fits).
    lt = jnp.log(th_eps)
    t2 = ((theta + y_true) * (jnp.log(th_eps + y_pred) - lt)
          + y_true * (lt - jnp.log(y_pred + eps)))
    val = t1 + t2

    def accumulate(v):
        if fold:
            # Fold the (tile_rows, C) tile into the (8, C) accumulator using
            # sublane-aligned static slices (pure VPU adds, no layout crossing).
            s = v[0:8]
            for i in range(1, tile_rows // 8):
                s = s + v[i * 8:(i + 1) * 8]
            v = s
        acc_ref[...] += v

    rb = c * steps + k                               # row-block index
    needs_mask = (rb + 1) * tile_rows > n_rows       # only the boundary tile(s)

    @pl.when(jnp.logical_not(needs_mask))
    def _():
        accumulate(val)

    @pl.when(needs_mask)
    def _():
        # Row-only bound check (no flat-index int32 overflow). OOB rows of a
        # partial boundary block hold garbage and MUST stay behind this select.
        row = lax.broadcasted_iota(jnp.int32, val.shape, 0)
        valid = rb * tile_rows + row < n_rows
        accumulate(jnp.where(valid, val, 0.0))

    @pl.when(k == steps - 1)
    def _():
        # Single cross-lane/sublane reduce per core, done once at the end.
        out_ref[...] = jnp.zeros(out_ref.shape, jnp.float32) + jnp.sum(acc_ref[...])


@functools.partial(
    jax.jit,
    static_argnames=("scale_factor", "eps", "target_block_elems", "num_splits"))
def negative_binomial_loss(preds, theta, truth, *, scale_factor=1.0, eps=1e-10,
                           target_block_elems=2048 * 128, num_splits=1):
    """Mean NB negative log-likelihood over all elements (Pallas TPU kernel)."""
    assert preds.shape == theta.shape == truth.shape
    n = int(preds.size)
    assert n > 0

    # Free 2-D view (no host-side padding / concatenate): collapse leading dims,
    # keep the native last dim as the lane dim; in-kernel masking handles the
    # ragged row tail. Inputs stay in their native dtype (bf16 passes through).
    if preds.ndim >= 2:
        c_dim = preds.shape[-1]
        r_dim = n // c_dim
    elif n % _LANES == 0:
        c_dim, r_dim = _LANES, n // _LANES
    else:
        c_dim, r_dim = n, 1

    # Row tile: ~1 MiB f32 per input block (3 inputs x 2 buffers ~= 6 MiB, safely
    # inside the 16 MiB v5e default scoped VMEM; fine on v6e/v7x), sublane aligned.
    if r_dim < 8:
        tile_rows = r_dim
    else:
        tile_rows = max(8, (target_block_elems // max(c_dim, 1)) // 8 * 8)
        tile_rows = min(tile_rows, (r_dim // 8) * 8)
    fold = (tile_rows % 8 == 0) and (tile_rows > 8)
    acc_rows = 8 if fold else tile_rows

    row_blocks = _cdiv(r_dim, tile_rows)
    steps = _cdiv(row_blocks, num_splits)

    kernel = functools.partial(
        _nb_kernel, n_rows=r_dim, tile_rows=tile_rows, steps=steps, fold=fold,
        scale_factor=float(scale_factor), eps=float(eps))

    # Clamp the row-block index so an over-split core never requests an OOB
    # block; its rows are all >= n_rows and get masked to zero in-kernel.
    in_spec = pl.BlockSpec(
        (tile_rows, c_dim),
        lambda c, k: (jnp.minimum(c * steps + k, row_blocks - 1), 0))
    # Per-core partial-sum output; (1, 8, 128) blocks keep (8,128) tiling happy,
    # only [c, 0, 0] is read back.
    out_spec = pl.BlockSpec((1, 8, _LANES), lambda c, k: (c, 0, 0))

    partials = pl.pallas_call(
        kernel,
        out_shape=jax.ShapeDtypeStruct((num_splits, 8, _LANES), jnp.float32),
        grid_spec=pltpu.PrefetchScalarGridSpec(
            num_scalar_prefetch=0,
            grid=(num_splits, steps),
            in_specs=[in_spec, in_spec, in_spec],
            out_specs=out_spec,
            scratch_shapes=[pltpu.VMEM((acc_rows, c_dim), jnp.float32)],
        ),
        # TODO(synk): on v7x, call with num_splits=2 and pltpu.CORE_PARALLEL on
        # the leading axis (or pl.core_map over create_tensorcore_mesh) so both
        # TensorCores provably share the streaming reduction.
        compiler_params=pltpu.CompilerParams(
            dimension_semantics=("parallel", "arbitrary")),
    )(preds.reshape(r_dim, c_dim), theta.reshape(r_dim, c_dim),
      truth.reshape(r_dim, c_dim))

    return jnp.sum(partials[:, 0, 0]) / jnp.float32(n)


class NegativeBinomialLoss:
    """JAX/Pallas port of the PyTorch NegativeBinomialLoss (mean=True path)."""

    def __init__(self, scale_factor=1.0, eps=1e-10, l1_lambda=0.0, mean=True):
        self.scale_factor = scale_factor
        self.eps = eps
        self.l1_lambda = l1_lambda
        self.mean = mean
        # TODO(synk): the torch debug=True NaN/Inf/negativity asserts are host-sync
        # blockers; use jax.experimental.checkify for device-side checks if needed.

    def forward(self, outp, batch):
        preds, theta = outp[:2]
        target = batch[0]
        if not self.mean:
            # TODO(synk): mean=False (elementwise retval) path not implemented in
            # the Pallas kernel; only the module's default mean=True is supported.
            raise NotImplementedError("mean=False not supported in Pallas path")
        l = negative_binomial_loss(preds, theta, target,
                                   scale_factor=self.scale_factor, eps=self.eps)
        if self.l1_lambda:
            encoded = outp[-1]
            l = l + self.l1_lambda * jnp.abs(encoded).sum()
        return l

    __call__ = forward


def _reference(preds, theta, truth, scale_factor=1.0, eps=1e-10):
    y_true = truth.astype(jnp.float32)
    y_pred = preds.astype(jnp.float32) * scale_factor
    th = jnp.minimum(theta.astype(jnp.float32), 1e6)
    t1 = (jsp_special.gammaln(th + eps) + jsp_special.gammaln(y_true + 1.0)
          - jsp_special.gammaln(y_true + th + eps))
    t2 = ((th + y_true) * jnp.log1p(y_pred / (th + eps))
          + y_true * (jnp.log(th + eps) - jnp.log(y_pred + eps)))
    return jnp.mean(t1 + t2)


if __name__ == "__main__":
    key = jax.random.PRNGKey(0)
    kp, kt, ky = jax.random.split(key, 3)

    # cells x genes; rows deliberately not a multiple of the 16-row tile so the
    # boundary-mask path runs without any host-side padding.
    B, G = 20, 256
    preds = jax.random.uniform(kp, (B, G), jnp.float32, 0.05, 5.0)   # positive means
    theta = jax.random.uniform(kt, (B, G), jnp.float32, 0.5, 2.0)    # positive dispersion
    truth = jax.random.poisson(ky, 3.0, (B, G)).astype(jnp.float32)  # count targets

    loss_fn = NegativeBinomialLoss()
    loss = loss_fn((preds, theta), (truth,))
    jax.block_until_ready(loss)
    ref = _reference(preds, theta, truth)
    assert jnp.allclose(loss, ref, rtol=1e-3, atol=1e-3), (loss, ref)

    # Small, non-aligned shape: <8 rows and a non-128 lane dim (full-dim blocks).
    p2 = jax.random.uniform(kp, (4, 96), jnp.float32, 0.05, 5.0)
    t2 = jax.random.uniform(kt, (4, 96), jnp.float32, 0.5, 2.0)
    y2 = jax.random.poisson(ky, 3.0, (4, 96)).astype(jnp.float32)
    l2 = negative_binomial_loss(p2, t2, y2)
    jax.block_until_ready(l2)
    r2 = _reference(p2, t2, y2)
    assert jnp.allclose(l2, r2, rtol=1e-3, atol=1e-3), (l2, r2)

    print("KERNEL_OK")
</pallas_src>

<mosaic_0001>
module attributes {stable_mosaic.version = 11 : i64} {
  func.func @_nb_kernel(%arg0: i32, %arg1: i32, %arg2: memref<16x256xf32, #tpu.memory_space<vmem>>, %arg3: memref<16x256xf32, #tpu.memory_space<vmem>>, %arg4: memref<16x256xf32, #tpu.memory_space<vmem>>, %arg5: memref<1x8x128xf32, #tpu.memory_space<vmem>>, %arg6: memref<8x256xf32, #tpu.memory_space<vmem>>) attributes {dimension_semantics = [#tpu.dimension_semantics<parallel>, #tpu.dimension_semantics<arbitrary>], iteration_bounds = array<i64: 1, 2>, scalar_prefetch = 0 : i64, scratch_operands = 1 : i64, tpu.core_type = #tpu.core_type<tc>, window_params = [{transform_indices = @transform_0, window_bounds = array<i64: 16, 256>}, {transform_indices = @transform_1, window_bounds = array<i64: 16, 256>}, {transform_indices = @transform_2, window_bounds = array<i64: 16, 256>}, {transform_indices = @transform_3, window_bounds = array<i64: 1, 8, 128>}]} {
    %c0_i32 = arith.constant 0 : i32
    %0 = arith.cmpi eq, %arg1, %c0_i32 : i32
    %1 = arith.extui %0 : i1 to i32
    %c0_i32_0 = arith.constant 0 : i32
    %2 = arith.cmpi ne, %1, %c0_i32_0 : i32
    scf.if %2 {
      %cst_40 = arith.constant 0.000000e+00 : f32
      %134 = vector.broadcast %cst_40 : f32 to vector<8x256xf32>
      %c0_41 = arith.constant 0 : index
      %c0_42 = arith.constant 0 : index
      %135 = vector.load %arg6[%c0_41, %c0_42] : memref<8x256xf32, #tpu.memory_space<vmem>>, vector<8x256xf32>
      tpu.vector_store %arg6[%c0_41, %c0_42], %134 {strides = array<i32>} : memref<8x256xf32, #tpu.memory_space<vmem>>, vector<8x256xf32>,
    } else {
    }
    %c0 = arith.constant 0 : index
    %c0_1 = arith.constant 0 : index
    %3 = vector.load %arg2[%c0, %c0_1] : memref<16x256xf32, #tpu.memory_space<vmem>>, vector<16x256xf32>
    %c0_2 = arith.constant 0 : index
    %c0_3 = arith.constant 0 : index
    %4 = vector.load %arg3[%c0_2, %c0_3] : memref<16x256xf32, #tpu.memory_space<vmem>>, vector<16x256xf32>
    %cst = arith.constant 1.000000e+06 : f32
    %5 = vector.broadcast %cst : f32 to vector<16x256xf32>
    %6 = arith.minimumf %4, %5 : vector<16x256xf32>
    %c0_4 = arith.constant 0 : index
    %c0_5 = arith.constant 0 : index
    %7 = vector.load %arg4[%c0_4, %c0_5] : memref<16x256xf32, #tpu.memory_space<vmem>>, vector<16x256xf32>
    %cst_6 = arith.constant 1.000000e-10 : f32
    %8 = vector.broadcast %cst_6 : f32 to vector<16x256xf32>
    %9 = arith.addf %6, %8 : vector<16x256xf32>
    %cst_7 = arith.constant 1.000000e+00 : f32
    %10 = vector.broadcast %cst_7 : f32 to vector<16x256xf32>
    %11 = arith.addf %9, %10 : vector<16x256xf32>
    %12 = arith.mulf %9, %11 : vector<16x256xf32>
    %cst_8 = arith.constant 2.000000e+00 : f32
    %13 = vector.broadcast %cst_8 : f32 to vector<16x256xf32>
    %14 = arith.addf %9, %13 : vector<16x256xf32>
    %15 = arith.mulf %12, %14 : vector<16x256xf32>
    %cst_9 = arith.constant 3.000000e+00 : f32
    %16 = vector.broadcast %cst_9 : f32 to vector<16x256xf32>
    %17 = arith.addf %9, %16 : vector<16x256xf32>
    %18 = arith.mulf %15, %17 : vector<16x256xf32>
    %cst_10 = arith.constant 4.000000e+00 : f32
    %19 = vector.broadcast %cst_10 : f32 to vector<16x256xf32>
    %20 = arith.addf %9, %19 : vector<16x256xf32>
    %21 = tpu.reciprocal %20 {approx = true} : vector<16x256xf32> -> vector<16x256xf32>
    %22 = arith.mulf %21, %21 : vector<16x256xf32>
    %cst_11 = arith.constant 7.93650805E-4 : f32
    %23 = vector.broadcast %cst_11 : f32 to vector<16x256xf32>
    %24 = arith.mulf %22, %23 : vector<16x256xf32>
    %cst_12 = arith.constant -0.00277777785 : f32
    %25 = vector.broadcast %cst_12 : f32 to vector<16x256xf32>
    %26 = arith.addf %25, %24 : vector<16x256xf32>
    %27 = arith.mulf %22, %26 : vector<16x256xf32>
    %cst_13 = arith.constant 0.0833333358 : f32
    %28 = vector.broadcast %cst_13 : f32 to vector<16x256xf32>
    %29 = arith.addf %28, %27 : vector<16x256xf32>
    %30 = arith.mulf %21, %29 : vector<16x256xf32>
    %cst_14 = arith.constant 5.000000e-01 : f32
    %31 = vector.broadcast %cst_14 : f32 to vector<16x256xf32>
    %32 = arith.subf %20, %31 : vector<16x256xf32>
    %33 = math.log %20 : vector<16x256xf32>
    %34 = arith.mulf %32, %33 : vector<16x256xf32>
    %35 = arith.subf %34, %20 : vector<16x256xf32>
    %cst_15 = arith.constant 0.918938517 : f32
    %36 = vector.broadcast %cst_15 : f32 to vector<16x256xf32>
    %37 = arith.addf %35, %36 : vector<16x256xf32>
    %38 = arith.addf %37, %30 : vector<16x256xf32>
    %39 = math.log %18 : vector<16x256xf32>
    %40 = arith.subf %38, %39 : vector<16x256xf32>
    %cst_16 = arith.constant 1.000000e+00 : f32
    %41 = vector.broadcast %cst_16 : f32 to vector<16x256xf32>
    %42 = arith.addf %7, %41 : vector<16x256xf32>
    %cst_17 = arith.constant 1.000000e+00 : f32
    %43 = vector.broadcast %cst_17 : f32 to vector<16x256xf32>
    %44 = arith.addf %42, %43 : vector<16x256xf32>
    %45 = arith.mulf %42, %44 : vector<16x256xf32>
    %cst_18 = arith.constant 2.000000e+00 : f32
    %46 = vector.broadcast %cst_18 : f32 to vector<16x256xf32>
    %47 = arith.addf %42, %46 : vector<16x256xf32>
    %48 = arith.mulf %45, %47 : vector<16x256xf32>
    %cst_19 = arith.constant 3.000000e+00 : f32
    %49 = vector.broadcast %cst_19 : f32 to vector<16x256xf32>
    %50 = arith.addf %42, %49 : vector<16x256xf32>
    %51 = arith.mulf %48, %50 : vector<16x256xf32>
    %cst_20 = arith.constant 4.000000e+00 : f32
    %52 = vector.broadcast %cst_20 : f32 to vector<16x256xf32>
    %53 = arith.addf %42, %52 : vector<16x256xf32>
    %54 = tpu.reciprocal %53 {approx = true} : vector<16x256xf32> -> vector<16x256xf32>
    %55 = arith.mulf %54, %54 : vector<16x256xf32>
    %cst_21 = arith.constant 7.93650805E-4 : f32
    %56 = vector.broadcast %cst_21 : f32 to vector<16x256xf32>
    %57 = arith.mulf %55, %56 : vector<16x256xf32>
    %cst_22 = arith.constant -0.00277777785 : f32
    %58 = vector.broadcast %cst_22 : f32 to vector<16x256xf32>
    %59 = arith.addf %58, %57 : vector<16x256xf32>
    %60 = arith.mulf %55, %59 : vector<16x256xf32>
    %cst_23 = arith.constant 0.0833333358 : f32
    %61 = vector.broadcast %cst_23 : f32 to vector<16x256xf32>
    %62 = arith.addf %61, %60 : vector<16x256xf32>
    %63 = arith.mulf %54, %62 : vector<16x256xf32>
    %cst_24 = arith.constant 5.000000e-01 : f32
    %64 = vector.broadcast %cst_24 : f32 to vector<16x256xf32>
    %65 = arith.subf %53, %64 : vector<16x256xf32>
    %66 = math.log %53 : vector<16x256xf32>
    %67 = arith.mulf %65, %66 : vector<16x256xf32>
    %68 = arith.subf %67, %53 : vector<16x256xf32>
    %cst_25 = arith.constant 0.918938517 : f32
    %69 = vector.broadcast %cst_25 : f32 to vector<16x256xf32>
    %70 = arith.addf %68, %69 : vector<16x256xf32>
    %71 = arith.addf %70, %63 : vector<16x256xf32>
    %72 = math.log %51 : vector<16x256xf32>
    %73 = arith.subf %71, %72 : vector<16x256xf32>
    %74 = arith.addf %40, %73 : vector<16x256xf32>
    %75 = arith.addf %7, %9 : vector<16x256xf32>
    %cst_26 = arith.constant 1.000000e+00 : f32
    %76 = vector.broadcast %cst_26 : f32 to vector<16x256xf32>
    %77 = arith.addf %75, %76 : vector<16x256xf32>
    %78 = arith.mulf %75, %77 : vector<16x256xf32>
    %cst_27 = arith.constant 2.000000e+00 : f32
    %79 = vector.broadcast %cst_27 : f32 to vector<16x256xf32>
    %80 = arith.addf %75, %79 : vector<16x256xf32>
    %81 = arith.mulf %78, %80 : vector<16x256xf32>
    %cst_28 = arith.constant 3.000000e+00 : f32
    %82 = vector.broadcast %cst_28 : f32 to vector<16x256xf32>
    %83 = arith.addf %75, %82 : vector<16x256xf32>
    %84 = arith.mulf %81, %83 : vector<16x256xf32>
    %cst_29 = arith.constant 4.000000e+00 : f32
    %85 = vector.broadcast %cst_29 : f32 to vector<16x256xf32>
    %86 = arith.addf %75, %85 : vector<16x256xf32>
    %87 = tpu.reciprocal %86 {approx = true} : vector<16x256xf32> -> vector<16x256xf32>
    %88 = arith.mulf %87, %87 : vector<16x256xf32>
    %cst_30 = arith.constant 7.93650805E-4 : f32
    %89 = vector.broadcast %cst_30 : f32 to vector<16x256xf32>
    %90 = arith.mulf %88, %89 : vector<16x256xf32>
    %cst_31 = arith.constant -0.00277777785 : f32
    %91 = vector.broadcast %cst_31 : f32 to vector<16x256xf32>
    %92 = arith.addf %91, %90 : vector<16x256xf32>
    %93 = arith.mulf %88, %92 : vector<16x256xf32>
    %cst_32 = arith.constant 0.0833333358 : f32
    %94 = vector.broadcast %cst_32 : f32 to vector<16x256xf32>
    %95 = arith.addf %94, %93 : vector<16x256xf32>
    %96 = arith.mulf %87, %95 : vector<16x256xf32>
    %cst_33 = arith.constant 5.000000e-01 : f32
    %97 = vector.broadcast %cst_33 : f32 to vector<16x256xf32>
    %98 = arith.subf %86, %97 : vector<16x256xf32>
    %99 = math.log %86 : vector<16x256xf32>
    %100 = arith.mulf %98, %99 : vector<16x256xf32>
    %101 = arith.subf %100, %86 : vector<16x256xf32>
    %cst_34 = arith.constant 0.918938517 : f32
    %102 = vector.broadcast %cst_34 : f32 to vector<16x256xf32>
    %103 = arith.addf %101, %102 : vector<16x256xf32>
    %104 = arith.addf %103, %96 : vector<16x256xf32>
    %105 = math.log %84 : vector<16x256xf32>
    %106 = arith.subf %104, %105 : vector<16x256xf32>
    %107 = arith.subf %74, %106 : vector<16x256xf32>
    %108 = math.log %9 : vector<16x256xf32>
    %109 = arith.addf %6, %7 : vector<16x256xf32>
    %110 = arith.addf %9, %3 : vector<16x256xf32>
    %111 = math.log %110 : vector<16x256xf32>
    %112 = arith.subf %111, %108 : vector<16x256xf32>
    %113 = arith.mulf %109, %112 : vector<16x256xf32>
    %cst_35 = arith.constant 1.000000e-10 : f32
    %114 = vector.broadcast %cst_35 : f32 to vector<16x256xf32>
    %115 = arith.addf %3, %114 : vector<16x256xf32>
    %116 = math.log %115 : vector<16x256xf32>
    %117 = arith.subf %108, %116 : vector<16x256xf32>
    %118 = arith.mulf %7, %117 : vector<16x256xf32>
    %119 = arith.addf %113, %118 : vector<16x256xf32>
    %120 = arith.addf %107, %119 : vector<16x256xf32>
    %c2_i32 = arith.constant 2 : i32
    %121 = arith.muli %arg0, %c2_i32 : i32
    %122 = arith.addi %121, %arg1 : i32
    %c1_i32 = arith.constant 1 : i32
    %123 = arith.addi %122, %c1_i32 : i32
    %c16_i32 = arith.constant 16 : i32
    %124 = arith.muli %123, %c16_i32 : i32
    %c20_i32 = arith.constant 20 : i32
    %125 = arith.cmpi sgt, %124, %c20_i32 : i32
    %true = arith.constant true
    %126 = arith.xori %125, %true : i1
    %127 = arith.extui %126 : i1 to i32
    %c0_i32_36 = arith.constant 0 : i32
    %128 = arith.cmpi ne, %127, %c0_i32_36 : i32
    scf.if %128 {
      %134 = vector.extract_strided_slice %120 {offsets = [0, 0], sizes = [8, 256], strides = [1, 1]} : vector<16x256xf32> to vector<8x256xf32>
      %135 = vector.extract_strided_slice %120 {offsets = [8, 0], sizes = [8, 256], strides = [1, 1]} : vector<16x256xf32> to vector<8x256xf32>
      %136 = arith.addf %134, %135 : vector<8x256xf32>
      %c0_40 = arith.constant 0 : index
      %c0_41 = arith.constant 0 : index
      %137 = vector.load %arg6[%c0_40, %c0_41] : memref<8x256xf32, #tpu.memory_space<vmem>>, vector<8x256xf32>
      %138 = arith.addf %137, %136 : vector<8x256xf32>
      %c0_42 = arith.constant 0 : index
      %c0_43 = arith.constant 0 : index
      %139 = vector.load %arg6[%c0_42, %c0_43] : memref<8x256xf32, #tpu.memory_space<vmem>>, vector<8x256xf32>
      tpu.vector_store %arg6[%c0_42, %c0_43], %138 {strides = array<i32>} : memref<8x256xf32, #tpu.memory_space<vmem>>, vector<8x256xf32>,
    } else {
    }
    %129 = arith.extui %125 : i1 to i32
    %c0_i32_37 = arith.constant 0 : i32
    %130 = arith.cmpi ne, %129, %c0_i32_37 : i32
    scf.if %130 {
      %134 = tpu.iota {dimensions = array<i32: 0>} : vector<16x256xi32>
      %c16_i32_40 = arith.constant 16 : i32
      %135 = arith.muli %122, %c16_i32_40 : i32
      %136 = vector.broadcast %135 : i32 to vector<16x256xi32>
      %137 = arith.addi %136, %134 : vector<16x256xi32>
      %c20_i32_41 = arith.constant 20 : i32
      %138 = vector.broadcast %c20_i32_41 : i32 to vector<16x256xi32>
      %139 = arith.cmpi slt, %137, %138 : vector<16x256xi32>
      %cst_42 = arith.constant 0.000000e+00 : f32
      %140 = vector.broadcast %cst_42 : f32 to vector<16x256xf32>
      %141 = arith.select %139, %120, %140 : vector<16x256xi1>, vector<16x256xf32>
      %142 = vector.extract_strided_slice %141 {offsets = [0, 0], sizes = [8, 256], strides = [1, 1]} : vector<16x256xf32> to vector<8x256xf32>
      %143 = vector.extract_strided_slice %141 {offsets = [8, 0], sizes = [8, 256], strides = [1, 1]} : vector<16x256xf32> to vector<8x256xf32>
      %144 = arith.addf %142, %143 : vector<8x256xf32>
      %c0_43 = arith.constant 0 : index
      %c0_44 = arith.constant 0 : index
      %145 = vector.load %arg6[%c0_43, %c0_44] : memref<8x256xf32, #tpu.memory_space<vmem>>, vector<8x256xf32>
      %146 = arith.addf %145, %144 : vector<8x256xf32>
      %c0_45 = arith.constant 0 : index
      %c0_46 = arith.constant 0 : index
      %147 = vector.load %arg6[%c0_45, %c0_46] : memref<8x256xf32, #tpu.memory_space<vmem>>, vector<8x256xf32>
      tpu.vector_store %arg6[%c0_45, %c0_46], %146 {strides = array<i32>} : memref<8x256xf32, #tpu.memory_space<vmem>>, vector<8x256xf32>,
    } else {
    }
    %c1_i32_38 = arith.constant 1 : i32
    %131 = arith.cmpi eq, %arg1, %c1_i32_38 : i32
    %132 = arith.extui %131 : i1 to i32
    %c0_i32_39 = arith.constant 0 : i32
    %133 = arith.cmpi ne, %132, %c0_i32_39 : i32
    scf.if %133 {
      %cst_40 = arith.constant 0.000000e+00 : f32
      %134 = vector.broadcast %cst_40 : f32 to vector<1x8x128xf32>
      %c0_41 = arith.constant 0 : index
      %c0_42 = arith.constant 0 : index
      %135 = vector.load %arg6[%c0_41, %c0_42] : memref<8x256xf32, #tpu.memory_space<vmem>>, vector<8x256xf32>
      %136 = vector.shape_cast %135 : vector<8x256xf32> to vector<1x8x256xf32>
      %cst_43 = arith.constant dense<0.000000e+00> : vector<1xf32>
      %137 = vector.multi_reduction <add>, %136, %cst_43 [1, 2] : vector<1x8x256xf32> to vector<1xf32>
      %138 = vector.shape_cast %137 : vector<1xf32> to vector<1x1x1xf32>
      %139 = vector.extract %138[0, 0, 0] : f32 from vector<1x1x1xf32>
      %140 = vector.broadcast %139 : f32 to vector<1x8x128xf32>
      %141 = arith.addf %134, %140 : vector<1x8x128xf32>
      %c0_44 = arith.constant 0 : index
      %c0_45 = arith.constant 0 : index
      %c0_46 = arith.constant 0 : index
      %142 = vector.load %arg5[%c0_44, %c0_45, %c0_46] : memref<1x8x128xf32, #tpu.memory_space<vmem>>, vector<1x8x128xf32>
      tpu.vector_store %arg5[%c0_44, %c0_45, %c0_46], %141 {strides = array<i32>} : memref<1x8x128xf32, #tpu.memory_space<vmem>>, vector<1x8x128xf32>,
    } else {
    }
    return
  }
  func.func @transform_0(%arg0: i32, %arg1: i32) -> (i32, i32) {
    %c2_i32 = arith.constant 2 : i32
    %0 = arith.muli %arg0, %c2_i32 : i32
    %1 = arith.addi %0, %arg1 : i32
    %c1_i32 = arith.constant 1 : i32
    %2 = arith.minsi %1, %c1_i32 : i32
    %c0_i32 = arith.constant 0 : i32
    %c0_i32_0 = arith.constant 0 : i32
    return %2, %c0_i32 : i32, i32
  }
  func.func @transform_1(%arg0: i32, %arg1: i32) -> (i32, i32) {
    %c2_i32 = arith.constant 2 : i32
    %0 = arith.muli %arg0, %c2_i32 : i32
    %1 = arith.addi %0, %arg1 : i32
    %c1_i32 = arith.constant 1 : i32
    %2 = arith.minsi %1, %c1_i32 : i32
    %c0_i32 = arith.constant 0 : i32
    %c0_i32_0 = arith.constant 0 : i32
    return %2, %c0_i32 : i32, i32
  }
  func.func @transform_2(%arg0: i32, %arg1: i32) -> (i32, i32) {
    %c2_i32 = arith.constant 2 : i32
    %0 = arith.muli %arg0, %c2_i32 : i32
    %1 = arith.addi %0, %arg1 : i32
    %c1_i32 = arith.constant 1 : i32
    %2 = arith.minsi %1, %c1_i32 : i32
    %c0_i32 = arith.constant 0 : i32
    %c0_i32_0 = arith.constant 0 : i32
    return %2, %c0_i32 : i32, i32
  }
  func.func @transform_3(%arg0: i32, %arg1: i32) -> (i32, i32, i32) {
    %c0_i32 = arith.constant 0 : i32
    %c0_i32_0 = arith.constant 0 : i32
    %c0_i32_1 = arith.constant 0 : i32
    return %arg0, %c0_i32, %c0_i32_0 : i32, i32, i32
  }
}

</mosaic_0001>

<bundles_post_ra>
// kernel: negative_binomial_loss.1
= control target key start
LH: loop header
LB: loop body
LE: loop exit
PB: predicated region body
PF: predicated region fallthrough
CT: control target
= control target key end

     0   :  { %8 = vsyncpa [#allocation4], 0  ;;  %s1936_s0 = inlined_call_operand.hbm [shape: f32[20,256], index: 0, kind: input, shape index: {}]   ;;  %s1937_s1 = inlined_call_operand.hbm [shape: f32[20,256], index: 1, kind: input, shape index: {}]   ;;  %s1938_s2 = inlined_call_operand.hbm [shape: f32[20,256], index: 2, kind: input, shape index: {}]   ;;  %s1939_s3 = inlined_call_operand.vmem [shape: f32[1,8,128], index: 3, kind: output, shape index: {}]  }
   0x1   :  { %10 = vsyncpa [#allocation4 + $0x1], 0 }
   0x2   :  { %11 = vsyncpa [#allocation6], 0 }
   0x3   :  { %13 = vsyncpa [#allocation6 + $0x1], 0  ;;  %s1365_s12 = smov 0   ;;  %s1367_s13 = smov 0  }
   0x4   :  { %s1369_s14 = smov 0   ;;  %s1371_s15 = smov 0  }
   0x5   :  { %s1373_s16 = smov 0   ;;  %s1375_s17 = smov 0  }
   0x6 LB: > { %s28_s18 = sadd.s32 1, %s1329_s16  ;;  %p37_p1 = scmp.lt.s32.totalorder %s1329_s16, 1  ;;  %s1333_s17 = sphi %s1375_s17, %s19_s17   ;;  %s1329_s16 = sphi %s1373_s16, %s1963_s16   ;;  %s1325_s15 = sphi %s1371_s15, %s1962_s15   ;;  %s1321_s14 = sphi %s1369_s14, %s1961_s14   ;;  %s1317_s13 = sphi %s1367_s13, %s1960_s13   ;;  %s1313_s12 = sphi %s1365_s12, %s1959_s12  }
   0x7   : > { %p29_p0 = scmp.ge.s32.totalorder %s28_s18, 2  ;;  %s940_s19 = sadd.s32 4294967295, %s1333_s17  }
   0x8   : > { %p53_p2 = scmp.ne.s32.totalorder %s1321_s14, %s1317_s13  ;;  %p54_p4 = scmp.eq.s32.totalorder %s1333_s17, 0 }
   0x9   : > { %s1965_s18 = smov (%p29_p0, %s28_s18), 0  ;;  %p59_p5 = scmp.ne.s32.totalorder %s1317_s13, %s1313_s12 }
   0xa   : > { %s1401_s20 = scalar_select %p37_p1, %s1329_s16, 1 }
   0xb   : > { %p41_p3 = scmp.lt.s32.totalorder %s1965_s18, 1  ;;  %p60_p6 = scmp.eq.s32.totalorder %s940_s19, 0 }
   0xc   : > { %p1409_p7 = por %p54_p4, %p53_p2  ;;  %s46_s25 = sadd.s32 1, %s1321_s14 }
   0xd   : > { %s42_s21 = scalar_select %p41_p3, %s1965_s18, 1 }
   0xe   : > { %p1413_p8 = por %p60_p6, %p59_p5  ;;  %p942_p10 = scmp.ge.s32.totalorder %s1333_s17, 2 }
   0xf   : > { %s43_s24 = ssub.s32 %s1401_s20, %s42_s21 }
  0x10   : > { %p44_p9 = scmp.eq.s32.totalorder %s43_s24, 0  ;;  %173 = sbr.rel (%p942_p10) target bundleno = 129 (0x81), region = 16 }
  0x12   : > { %s1420_s26 = scalar_select %p44_p9, %s1321_s14, %s46_s25  }
  0x15   : > { %176 = sbr.rel (!%p1409_p7) target bundleno = 57 (0x39), region = 20  ;;  %s177_s27 = sand.u32 (%p1409_p7), 1, %s1321_s14  }
  0x16   : > { %s944_s28 = sshll.u32 (%p1409_p7), %s1401_s20, 1  ;;  %s943_s29 = sshll.u32 (%p1409_p7), %s177_s27, 5 }
  0x17   : > { %s187_s30 = ssub.s32 (%p1409_p7), 3, %s944_s28  ;;  %s1430_s7 = scalar_lea.sflag (%p1409_p7), [#allocation4], %s177_s27 }
  0x18   : > { %p188_p11 = scmp.lt.s32.totalorder (%p1409_p7), %s187_s30, 2  ;;  %s181_s8 = scalar_lea.vmem (%p1409_p7), [#allocation3], %s943_s29 }
  0x1a   : > { %s1967_s30 = smov (!%p188_p11, %s187_s30), 2 }
  0x1b   : > { %s995_s4 = sshll.u32 %s1967_s30, 4 }
  0x1c   : > { %s192_s5 = ssub.s32 32, %s995_s4 }
  0x1d   : > { %s193_s6 = sshll.u32 %s192_s5, 4 }
  0x1e   : > { %194 = vsyncadd %s1430_s7, %s193_s6  ;;  %p1433_p12 = scmp.ne.s32.totalorder %s995_s4, 0  ;;  %s997_s10 = sshll.u32 %s1401_s20, 5 }
  0x1f   : > { %s198_s21 = scalar_lea.hbm %s1936_s0, %s997_s10  ;;  %s1441_s24 = sshll.u32 %s181_s8, 4  ;;  %s203_s24 = int_to_ptr.vmem [resolvable:$true] %s1441_s24 }
  0x20   : > { %s200_s25 = sshll.u32 %s198_s21, 4  ;;  %s951_s27 = sshll.u32 %s1967_s30, 8  ;;  %s1444_s25 = int_to_ptr.hbm [resolvable:$true] %s200_s25 }
  0x21   : > { %s1162_s28 = sshra.s32 %s1444_s25, 4  ;;  %s1164_s29 = sshrl.u32 %s951_s27, 4  ;;  %s1163_s28 = int_to_ptr.hbm [resolvable:$true] %s1162_s28 }
  0x22   : > { %s1169_s4 = scalar_lea.hbm %s1163_s28, %s1164_s29  ;;  %s1173_s8 = scalar_lea.hbm %s1936_s0, 48 }
  0x23   : > { %p1170_p13 = scmp.ne.s32.totalorder %s1163_s28, %s1169_s4  ;;  %p1175_p2 = scmp.lt.s32.totalorder %s1173_s8, %s1169_s4 }
  0x25   : > { %p1171_p0 = pnand %p1170_p13, %p1433_p12 }
  0x27   : > { %p1172_p1 = pneg %p1171_p0 }
  0x29   : > { %p1177_p3 = pnand %p1175_p2, %p1172_p1 }
  0x2b   : > { %1180 = shalt.err (!%p1177_p3)
}
  0x2c   : > { %s1181_s10 = sshra.s32 %s203_s24, 4  ;;  %s1335_s12 = smov [#allocation3]   ;;  %s1182_s10 = int_to_ptr.vmem [resolvable:$true] %s1181_s10 }
  0x2d   : > { %s1188_s11 = scalar_lea.vmem %s1182_s10, %s1164_s29  ;;  %s1192_s21 = scalar_lea.vmem %s1335_s12, 64 }
  0x2e   : > { %p1189_p4 = scmp.ne.s32.totalorder %s1182_s10, %s1188_s11  ;;  %p1194_p9 = scmp.lt.s32.totalorder %s1192_s21, %s1188_s11 }
  0x30   : > { %p1190_p5 = pnand %p1189_p4, %p1433_p12 }
  0x32   : > { %p1191_p6 = pneg %p1190_p5 }
  0x34   : > { %p1196_p10 = pnand %p1194_p9, %p1191_p6 }
  0x36   : > { %1199 = shalt.err (!%p1196_p10)
}
  0x37   : > { %s1336_s28 = smov 256   ;;  %s1337_s4 = smov 16  }
  0x38   : > { %208 = dma.hbm_to_vmem [thread:$0]  (%p1433_p12), %s1444_s25, %s951_s27, %s203_s24, %s1430_s7, %s1336_s28, %s1336_s28, %s1337_s4  }
  0x39 PF: > { %211 = sbr.rel (!%p1409_p7) target bundleno = 93 (0x5d), region = 24  ;;  %s212_s29 = sand.u32 (%p1409_p7), 1, %s1333_s17  }
  0x3a   : > { %s214_s5 = sand.u32 (%p1409_p7), 1, %s1321_s14   ;;  %s953_s8 = sshll.u32 (%p1409_p7), %s1401_s20, 1 }
  0x3b   : > { %s952_s6 = sshll.u32 (%p1409_p7), %s214_s5, 5  ;;  %s222_s10 = ssub.s32 (%p1409_p7), 3, %s953_s8 }
  0x3c   : > { %p223_p11 = scmp.lt.s32.totalorder (%p1409_p7), %s222_s10, 2  ;;  %s1475_s7 = scalar_lea.sflag (%p1409_p7), [#allocation6], %s212_s29 }
  0x3d   : > { %s216_s24 = scalar_lea.vmem (%p1409_p7), [#allocation5], %s952_s6 }
  0x3e   : > { %s1969_s10 = smov (!%p223_p11, %s222_s10), 2 }
  0x3f   : > { %s998_s9 = sshll.u32 %s1969_s10, 4 }
  0x40   : > { %s227_s11 = ssub.s32 32, %s998_s9 }
  0x41   : > { %s228_s30 = sshll.u32 %s227_s11, 4 }
  0x42   : > { %229 = vsyncadd %s1475_s7, %s228_s30  ;;  %p1478_p12 = scmp.ne.s32.totalorder %s998_s9, 0  ;;  %s1000_s27 = sshll.u32 %s1401_s20, 5 }
  0x43   : > { %s233_s28 = scalar_lea.hbm %s1937_s1, %s1000_s27  ;;  %s1486_s4 = sshll.u32 %s216_s24, 4  ;;  %s238_s4 = int_to_ptr.vmem [resolvable:$true] %s1486_s4 }
  0x44   : > { %s235_s29 = sshll.u32 %s233_s28, 4  ;;  %s960_s5 = sshll.u32 %s1969_s10, 8  ;;  %s1489_s29 = int_to_ptr.hbm [resolvable:$true] %s235_s29 }
  0x45   : > { %s1201_s6 = sshra.s32 %s1489_s29, 4  ;;  %s1203_s8 = sshrl.u32 %s960_s5, 4  ;;  %s1202_s6 = int_to_ptr.hbm [resolvable:$true] %s1201_s6 }
  0x46   : > { %s1208_s9 = scalar_lea.hbm %s1202_s6, %s1203_s8  ;;  %s1212_s24 = scalar_lea.hbm %s1937_s1, 48 }
  0x47   : > { %p1209_p13 = scmp.ne.s32.totalorder %s1202_s6, %s1208_s9  ;;  %p1214_p2 = scmp.lt.s32.totalorder %s1212_s24, %s1208_s9 }
  0x49   : > { %p1210_p0 = pnand %p1209_p13, %p1478_p12 }
  0x4b   : > { %p1211_p1 = pneg %p1210_p0 }
  0x4d   : > { %p1216_p3 = pnand %p1214_p2, %p1211_p1 }
  0x4f   : > { %1219 = shalt.err (!%p1216_p3)
}
  0x50   : > { %s1220_s27 = sshra.s32 %s238_s4, 4  ;;  %s1338_s21 = smov [#allocation5]   ;;  %s1221_s27 = int_to_ptr.vmem [resolvable:$true] %s1220_s27 }
  0x51   : > { %s1227_s12 = scalar_lea.vmem %s1221_s27, %s1203_s8  ;;  %s1231_s28 = scalar_lea.vmem %s1338_s21, 64 }
  0x52   : > { %p1228_p4 = scmp.ne.s32.totalorder %s1221_s27, %s1227_s12  ;;  %p1233_p9 = scmp.lt.s32.totalorder %s1231_s28, %s1227_s12 }
  0x54   : > { %p1229_p5 = pnand %p1228_p4, %p1478_p12 }
  0x56   : > { %p1230_p6 = pneg %p1229_p5 }
  0x58   : > { %p1235_p10 = pnand %p1233_p9, %p1230_p6 }
  0x5a   : > { %1238 = shalt.err (!%p1235_p10)
}
  0x5b   : > { %s1339_s6 = smov 256   ;;  %s1340_s9 = smov 16  }
  0x5c   : > { %243 = dma.hbm_to_vmem [thread:$0]  (%p1478_p12), %s1489_s29, %s960_s5, %s238_s4, %s1475_s7, %s1339_s6, %s1339_s6, %s1340_s9  }
  0x5d PF: > { %246 = sbr.rel (!%p1409_p7) target bundleno = 129 (0x81), region = 28  ;;  %s247_s8 = sand.u32 (%p1409_p7), 1, %s1333_s17  }
  0x5e   : > { %s249_s11 = sand.u32 (%p1409_p7), 1, %s1321_s14   ;;  %s962_s24 = sshll.u32 (%p1409_p7), %s1401_s20, 1 }
  0x5f   : > { %s961_s30 = sshll.u32 (%p1409_p7), %s249_s11, 5  ;;  %s257_s27 = ssub.s32 (%p1409_p7), 3, %s962_s24 }
  0x60   : > { %p258_p11 = scmp.lt.s32.totalorder (%p1409_p7), %s257_s27, 2  ;;  %s1520_s7 = scalar_lea.sflag (%p1409_p7), [#allocation6], %s247_s8 }
  0x61   : > { %s251_s22 = scalar_lea.vmem (%p1409_p7), [#allocation7], %s961_s30 }
  0x62   : > { %s1971_s27 = smov (!%p258_p11, %s257_s27), 2 }
  0x63   : > { %s1001_s25 = sshll.u32 %s1971_s27, 4 }
  0x64   : > { %s262_s12 = ssub.s32 32, %s1001_s25 }
  0x65   : > { %s263_s10 = sshll.u32 %s262_s12, 4 }
  0x66   : > { %264 = vsyncadd %s1520_s7, %s263_s10  ;;  %p1523_p7 = scmp.ne.s32.totalorder %s1001_s25, 0  ;;  %s1003_s29 = sshll.u32 %s1401_s20, 5 }
  0x67   : > { %s268_s28 = scalar_lea.hbm %s1938_s2, %s1003_s29  ;;  %s1531_s6 = sshll.u32 %s251_s22, 4  ;;  %s273_s6 = int_to_ptr.vmem [resolvable:$true] %s1531_s6 }
  0x68   : > { %s270_s9 = sshll.u32 %s268_s28, 4  ;;  %s969_s8 = sshll.u32 %s1971_s27, 8  ;;  %s1534_s9 = int_to_ptr.hbm [resolvable:$true] %s270_s9 }
  0x69   : > { %s1240_s11 = sshra.s32 %s1534_s9, 4  ;;  %s1242_s30 = sshrl.u32 %s969_s8, 4  ;;  %s1241_s11 = int_to_ptr.hbm [resolvable:$true] %s1240_s11 }
  0x6a   : > { %s1247_s24 = scalar_lea.hbm %s1241_s11, %s1242_s30  ;;  %s1251_s12 = scalar_lea.hbm %s1938_s2, 48 }
  0x6b   : > { %p1248_p12 = scmp.ne.s32.totalorder %s1241_s11, %s1247_s24  ;;  %p1253_p1 = scmp.lt.s32.totalorder %s1251_s12, %s1247_s24 }
  0x6d   : > { %p1249_p13 = pnand %p1248_p12, %p1523_p7 }
  0x6f   : > { %p1250_p0 = pneg %p1249_p13 }
  0x71   : > { %p1255_p2 = pnand %p1253_p1, %p1250_p0 }
  0x73   : > { %1258 = shalt.err (!%p1255_p2)
}
  0x74   : > { %s1259_s10 = sshra.s32 %s273_s6, 4  ;;  %s1341_s29 = smov [#allocation7]   ;;  %s1260_s10 = int_to_ptr.vmem [resolvable:$true] %s1259_s10 }
  0x75   : > { %s1266_s22 = scalar_lea.vmem %s1260_s10, %s1242_s30  ;;  %s1270_s5 = scalar_lea.vmem %s1341_s29, 64 }
  0x76   : > { %p1267_p3 = scmp.ne.s32.totalorder %s1260_s10, %s1266_s22  ;;  %p1272_p6 = scmp.lt.s32.totalorder %s1270_s5, %s1266_s22 }
  0x78   : > { %p1268_p4 = pnand %p1267_p3, %p1523_p7 }
  0x7a   : > { %p1269_p5 = pneg %p1268_p4 }
  0x7c   : > { %p1274_p9 = pnand %p1272_p6, %p1269_p5 }
  0x7e   : > { %1277 = shalt.err (!%p1274_p9)
}
  0x7f   : > { %s1342_s21 = smov 256   ;;  %s1343_s28 = smov 16  }
  0x80   : > { %278 = dma.hbm_to_vmem [thread:$0]  (%p1523_p7), %s1534_s9, %s969_s8, %s273_s6, %s1520_s7, %s1342_s21, %s1342_s21, %s1343_s28  }
  0x81 PF: > { %p970_p10 = scmp.ge.s32.totalorder %s1333_s17, 1  ;;  %p280_p11 = scmp.lt.s32.totalorder %s1333_s17, 3 }
  0x83   : > { %p281_p12 = pnand %p970_p10, %p280_p11 }
  0x85   : > { %284 = sbr.rel (%p281_p12) target bundleno = 474 (0x1da), region = 32 }
  0x8a   : > { %s286_s11 = sand.u32 1, %s1317_s13  }
  0x8b   : > { %s971_s30 = sshll.u32 %s286_s11, 5  ;;  %s287_s24 = scalar_lea.sflag [#allocation4], %s286_s11 }
  0x8c   : > { %s1560_s20 = scalar_lea.vmem [#allocation3], %s971_s30 }
  0x8d   : > { %1304 = dma.done.wait (%p1413_p8), %s287_s24, 512  }
  0x8e   : > { %1306 = vsyncadd (%p1413_p8), %s287_s24, 4294966784  ;;  %s296_s27 = sand.u32 1, %s940_s19   ;;  %s300_s4 = scalar_lea.vmem [#allocation5], %s971_s30 }
  0x8f   : > { %s297_s7 = scalar_lea.sflag [#allocation6], %s296_s27 }
  0x90   : > { %1308 = dma.done.wait (%p1413_p8), %s297_s7, 1024  }
  0x91   : > { %1310 = vsyncadd (%p1413_p8), %s297_s7, 4294966272  ;;  %s1572_s6 = scalar_lea.vmem [#allocation7], %s971_s30  ;;  %p974_p7 = scmp.ne.s32.totalorder %s1325_s15, 0 }
  0x93   : > { %380 = sbr.rel (%p974_p7) target bundleno = 155 (0x9b), region = 48 }
  0x98   : > { %v1344_v0 = vmov 0.0  }
  0x99   : > { %381 = vst [vmem:[#allocation2] sm:$0xff] %v1344_v0 }
  0x9a   : > { %382 = vst [vmem:[#allocation2 + $0x8] sm:$0xff] %v1344_v0 }
  0x9b PF: > { %s1004_s9 = sshll.u32 %s1325_s15, 4  ;;  %v1576_v1 = vld [vmem:[%s300_s4] sm:$0xff]  ;;  %v1578_v2 = vld [vmem:[%s300_s4 + $0x8] sm:$0xff]  ;;  %v1584_v3 = vld [vmem:[%s300_s4 + $0x10] sm:$0xff] }
  0x9c   : > { %s1582_s19 = sadd.s32 16, %s1004_s9  ;;  %v1586_v4 = vld [vmem:[%s300_s4 + $0x18] sm:$0xff]  ;;  %v1943_v5 = vmin.f32 %v1576_v1, 1000000.0  ;;  %v1942_v6 = vmin.f32 %v1578_v2, 1000000.0 }
  0x9d   : > { %v1941_v7 = vmin.f32 %v1584_v3, 1000000.0  ;;  %v1940_v8 = vmin.f32 %v1586_v4, 1000000.0  ;;  %v1654_v38 = vld [vmem:[%s1572_s6] sm:$0xff]  ;;  %v1657_v39 = vld [vmem:[%s1572_s6 + $0x8] sm:$0xff] }
  0x9e   : > { %v1594_v9 = vadd.f32 1e-10, %v1943_v5  ;;  %v1598_v10 = vadd.f32 1e-10, %v1942_v6  ;;  %v1667_v49 = vld [vmem:[%s1572_s6 + $0x10] sm:$0xff]  ;;  %v1670_v51 = vadd.f32 1.0, %v1654_v38 }
  0x9f   : > { %v1602_v11 = vadd.f32 1e-10, %v1941_v7  ;;  %v1606_v12 = vadd.f32 1e-10, %v1940_v8  ;;  %v1673_v52 = vadd.f32 1.0, %v1657_v39  ;;  %v1676_v54 = vld [vmem:[%s1572_s6 + $0x18] sm:$0xff] }
  0xa0   : > { %v1609_v13 = vadd.f32 4.0, %v1594_v9  ;;  %v1612_v14 = vadd.f32 4.0, %v1598_v10  ;;  %v403_v17 = vadd.f32 1.0, %v1594_v9  ;;  %v404_v18 = vadd.f32 1.0, %v1598_v10  ;;  %1951 = vst [vmem:[#allocation10_spill] sm:$0xff] %v1676_v54  ;;  %p988_p8 = scmp.gt.s32.totalorder %s1582_s19, 20 }
  0xa1   : > { %v1615_v15 = vadd.f32 4.0, %v1602_v11  ;;  %v1618_v16 = vadd.f32 4.0, %v1606_v12  ;;  %v405_v19 = vadd.f32 1.0, %v1602_v11  ;;  %v406_v20 = vadd.f32 1.0, %v1606_v12 }
  0xa2   : > { %1066 = vrcp.f32 %v1609_v13  ;;  %v411_v22 = vadd.f32 2.0, %v1594_v9  ;;  %v412_v23 = vadd.f32 2.0, %v1598_v10  ;;  %v407_v25 = vmul.f32 %v403_v17, %v1594_v9 }
  0xa3   : > { %1068 = vrcp.f32 %v1612_v14  ;;  %v408_v26 = vmul.f32 %v404_v18, %v1598_v10  ;;  %v409_v27 = vmul.f32 %v405_v19, %v1602_v11  ;;  %v413_v28 = vadd.f32 2.0, %v1602_v11 }
  0xa4   : > { %1070 = vrcp.f32 %v1615_v15  ;;  %v410_v29 = vmul.f32 %v406_v20, %v1606_v12  ;;  %v414_v30 = vadd.f32 2.0, %v1606_v12  ;;  %v419_v34 = vadd.f32 3.0, %v1594_v9 }
  0xa5   : > { %1072 = vrcp.f32 %v1618_v16  ;;  %v420_v35 = vadd.f32 3.0, %v1598_v10  ;;  %v421_v36 = vadd.f32 3.0, %v1602_v11  ;;  %v415_v40 = vmul.f32 %v411_v22, %v407_v25 }
  0xa6   : > { %1074 = vlog2.f32 %v1609_v13  ;;  %v416_v41 = vmul.f32 %v412_v23, %v408_v26  ;;  %v417_v42 = vmul.f32 %v413_v28, %v409_v27  ;;  %v418_v43 = vmul.f32 %v414_v30, %v410_v29 }
  0xa7   : > { %1076 = vlog2.f32 %v1612_v14  ;;  %v422_v44 = vadd.f32 3.0, %v1606_v12  ;;  %v423_v55 = vmul.f32 %v419_v34, %v415_v40  ;;  %v975_v58 = vadd.f32 -0.5, %v1609_v13 }
  0xa8   : > { %v1628_v21 = vpop.eup %1066  ;;  %1078 = vlog2.f32 %v1615_v15  ;;  %v424_v56 = vmul.f32 %v420_v35, %v416_v41  ;;  %v425_v57 = vmul.f32 %v421_v36, %v417_v42  ;;  %v976_v62 = vadd.f32 -0.5, %v1612_v14 }
  0xa9   : > { %v1632_v24 = vpop.eup %1068  ;;  %v435_v31 = vmul.f32 %v1628_v21, %v1628_v21  ;;  %1080 = vlog2.f32 %v1618_v16  ;;  %v426_v59 = vmul.f32 %v422_v44, %v418_v43  ;;  %v977_v17 = vadd.f32 -0.5, %v1615_v15 }
  0xaa   : > { %v1643_v32 = vpop.eup %1070  ;;  %v436_v37 = vmul.f32 %v1632_v24, %v1632_v24  ;;  %v1682_v19 = vadd.f32 1.0, %v1667_v49  ;;  %v978_v22 = vadd.f32 -0.5, %v1618_v16  ;;  %v1686_v25 = vadd.f32 1.0, %v1676_v54 }
  0xab   : > { %v1646_v33 = vpop.eup %1072  ;;  %v437_v45 = vmul.f32 %v1643_v32, %v1643_v32  ;;  %v439_v46 = vmul.f32 0.0007936508, %v435_v31  ;;  %v503_v27 = vadd.f32 1.0, %v1670_v51  ;;  %v504_v28 = vadd.f32 1.0, %v1673_v52 }
  0xac   : > { %v438_v47 = vmul.f32 %v1646_v33, %v1646_v33  ;;  %v1075_v48 = vpop.eup %1074  ;;  %v440_v50 = vmul.f32 0.0007936508, %v436_v37  ;;  %v505_v29 = vadd.f32 1.0, %v1682_v19  ;;  %v511_v30 = vadd.f32 2.0, %v1670_v51 }
  0xad   : > { %v1077_v53 = vpop.eup %1076  ;;  %v441_v60 = vmul.f32 0.0007936508, %v437_v45  ;;  %v443_v61 = vadd.f32 -0.0027777778, %v439_v46  ;;  %v464_v18 = vmul.f32 0.6931472, %v1075_v48  ;;  %1082 = vlog2.f32 %v423_v55 }
  0xae   : > { %v1079_v63 = vpop.eup %1078  ;;  %v442_v0 = vmul.f32 0.0007936508, %v438_v47  ;;  %v444_v20 = vadd.f32 -0.0027777778, %v440_v50  ;;  %v466_v23 = vmul.f32 0.6931472, %v1077_v53  ;;  %1084 = vlog2.f32 %v424_v56 }
  0xaf   : > { %v1081_v26 = vpop.eup %1080  ;;  %v445_v34 = vadd.f32 -0.0027777778, %v441_v60  ;;  %v447_v35 = vmul.f32 %v443_v61, %v435_v31  ;;  %v468_v36 = vmul.f32 0.6931472, %v1079_v63  ;;  %v512_v40 = vadd.f32 2.0, %v1673_v52 }
  0xb0   : > { %v446_v41 = vadd.f32 -0.0027777778, %v442_v0  ;;  %v471_v42 = vmul.f32 %v975_v58, %v464_v18  ;;  %v506_v43 = vadd.f32 1.0, %v1686_v25  ;;  %v448_v44 = vmul.f32 %v444_v20, %v436_v37 }
  0xb1   : > { %v470_v46 = vmul.f32 0.6931472, %v1081_v26  ;;  %v472_v48 = vmul.f32 %v976_v62, %v466_v23  ;;  %1086 = vlog2.f32 %v425_v57  ;;  %v507_v50 = vmul.f32 %v503_v27, %v1670_v51 }
  0xb2   : > { %v1696_v53 = vadd.f32 4.0, %v1670_v51  ;;  %v1699_v31 = vadd.f32 4.0, %v1673_v52  ;;  %v449_v60 = vmul.f32 %v445_v34, %v437_v45  ;;  %v451_v61 = vadd.f32 0.083333336, %v447_v35 }
  0xb3   : > { %v473_v63 = vmul.f32 %v977_v17, %v468_v36  ;;  %v1702_v55 = vadd.f32 4.0, %v1682_v19  ;;  %v450_v58 = vmul.f32 %v446_v41, %v438_v47  ;;  %v475_v37 = vsub.f32 %v471_v42, %v1609_v13  ;;  %v1083_v45 = vpop.eup %1082 }
  0xb4   : > { %v1706_v56 = vadd.f32 4.0, %v1686_v25  ;;  %1088 = vrcp.f32 %v1696_v53  ;;  %v452_v57 = vadd.f32 0.083333336, %v448_v44  ;;  %v474_v62 = vmul.f32 %v978_v22, %v470_v46  ;;  %v1085_v13 = vpop.eup %1084 }
  0xb5   : > { %v476_v0 = vsub.f32 %v472_v48, %v1612_v14  ;;  %1090 = vrcp.f32 %v1699_v31  ;;  %v508_v17 = vmul.f32 %v504_v28, %v1673_v52  ;;  %v509_v18 = vmul.f32 %v505_v29, %v1682_v19 }
  0xb6   : > { %v513_v47 = vadd.f32 2.0, %v1682_v19  ;;  %1092 = vrcp.f32 %v1702_v55  ;;  %v453_v20 = vadd.f32 0.083333336, %v449_v60  ;;  %v477_v23 = vsub.f32 %v473_v63, %v1615_v15 }
  0xb7   : > { %v514_v26 = vadd.f32 2.0, %v1686_v25  ;;  %1094 = vrcp.f32 %v1706_v56  ;;  %v1087_v14 = vpop.eup %1086  ;;  %v455_v22 = vmul.f32 %v1628_v21, %v451_v61  ;;  %v479_v27 = vadd.f32 0.9189385, %v475_v37 }
  0xb8   : > { %1096 = vlog2.f32 %v426_v59  ;;  %v510_v28 = vmul.f32 %v506_v43, %v1686_v25  ;;  %v454_v29 = vadd.f32 0.083333336, %v450_v58  ;;  %v456_v34 = vmul.f32 %v1632_v24, %v452_v57 }
  0xb9   : > { %v478_v35 = vsub.f32 %v474_v62, %v1618_v16  ;;  %v480_v36 = vadd.f32 0.9189385, %v476_v0  ;;  %v515_v15 = vmul.f32 %v511_v30, %v507_v50  ;;  %v516_v42 = vmul.f32 %v512_v40, %v508_v17 }
  0xba   : > { %v1722_v41 = vpop.eup %1088  ;;  %v517_v44 = vmul.f32 %v513_v47, %v509_v18  ;;  %1098 = vlog2.f32 %v1696_v53  ;;  %v457_v21 = vmul.f32 %v1643_v32, %v453_v20  ;;  %v481_v59 = vadd.f32 0.9189385, %v477_v23 }
  0xbb   : > { %v1725_v46 = vpop.eup %1090  ;;  %v519_v43 = vadd.f32 3.0, %v1670_v51  ;;  %v535_v24 = vmul.f32 %v1722_v41, %v1722_v41  ;;  %v1733_v16 = vadd.f32 %v479_v27, %v455_v22  ;;  %v1735_v60 = vmul.f32 0.6931472, %v1083_v45 }
  0xbc   : > { %v1731_v48 = vpop.eup %1092  ;;  %v536_v30 = vmul.f32 %v1725_v46, %v1725_v46  ;;  %1100 = vlog2.f32 %v1699_v31  ;;  %v458_v32 = vmul.f32 %v1646_v33, %v454_v29  ;;  %v482_v50 = vadd.f32 0.9189385, %v478_v35 }
  0xbd   : > { %v1740_v40 = vpop.eup %1094  ;;  %v1743_v51 = vadd.f32 %v480_v36, %v456_v34  ;;  %1102 = vlog2.f32 %v1702_v55  ;;  %v1746_v63 = vmul.f32 0.6931472, %v1085_v13  ;;  %v520_v58 = vadd.f32 3.0, %v1673_v52 }
  0xbe   : > { %v1097_v61 = vpop.eup %1096  ;;  %v521_v37 = vadd.f32 3.0, %v1682_v19  ;;  %v537_v57 = vmul.f32 %v1731_v48, %v1731_v48  ;;  %v518_v62 = vmul.f32 %v514_v26, %v510_v28  ;;  %v522_v0 = vadd.f32 3.0, %v1686_v25 }
  0xbf   : > { %v523_v45 = vmul.f32 %v519_v43, %v515_v15  ;;  %v539_v33 = vmul.f32 0.0007936508, %v535_v24  ;;  %v1753_v18 = vadd.f32 %v481_v59, %v457_v21  ;;  %v538_v47 = vmul.f32 %v1740_v40, %v1740_v40 }
  0xc0   : > { %v1099_v17 = vpop.eup %1098  ;;  %v540_v13 = vmul.f32 0.0007936508, %v536_v30  ;;  %1104 = vlog2.f32 %v1706_v56  ;;  %v1758_v52 = vadd.f32 %v482_v50, %v458_v32  ;;  %v1760_v19 = vmul.f32 0.6931472, %v1087_v14 }
  0xc1   : > { %v1762_v20 = vmul.f32 0.6931472, %v1097_v61  ;;  %v524_v22 = vmul.f32 %v520_v58, %v516_v42  ;;  %v525_v27 = vmul.f32 %v521_v37, %v517_v44  ;;  %v541_v28 = vmul.f32 0.0007936508, %v537_v57 }
  0xc2   : > { %v1101_v23 = vpop.eup %1100  ;;  %v526_v34 = vmul.f32 %v522_v0, %v518_v62  ;;  %v543_v35 = vadd.f32 -0.0027777778, %v539_v33  ;;  %v979_v36 = vadd.f32 -0.5, %v1696_v53  ;;  %v564_v15 = vmul.f32 0.6931472, %v1099_v17 }
  0xc3   : > { %v1103_v29 = vpop.eup %1102  ;;  %v542_v14 = vmul.f32 0.0007936508, %v538_v47  ;;  %v544_v21 = vadd.f32 -0.0027777778, %v540_v13  ;;  %v980_v59 = vadd.f32 -0.5, %v1699_v31  ;;  %v981_v43 = vadd.f32 -0.5, %v1702_v55 }
  0xc4   : > { %v982_v32 = vadd.f32 -0.5, %v1706_v56  ;;  %v566_v50 = vmul.f32 0.6931472, %v1101_v23  ;;  %v1774_v42 = vadd.f32 %v1594_v9, %v1654_v38  ;;  %v1778_v44 = vadd.f32 %v1598_v10, %v1657_v39 }
  0xc5   : > { %v545_v58 = vadd.f32 -0.0027777778, %v541_v28  ;;  %v568_v37 = vmul.f32 0.6931472, %v1103_v29  ;;  %v1782_v62 = vadd.f32 %v1602_v11, %v1667_v49  ;;  %v1786_v0 = vadd.f32 %v1606_v12, %v1676_v54 }
  0xc6   : > { %v1105_v61 = vpop.eup %1104  ;;  %v547_v33 = vmul.f32 %v543_v35, %v535_v24  ;;  %v571_v17 = vmul.f32 %v979_v36, %v564_v15  ;;  %v607_v13 = vadd.f32 1.0, %v1774_v42  ;;  %v615_v23 = vadd.f32 2.0, %v1774_v42 }
  0xc7   : > { %v546_v8 = vadd.f32 -0.0027777778, %v542_v14  ;;  %v548_v7 = vmul.f32 %v544_v21, %v536_v30  ;;  %v608_v6 = vadd.f32 1.0, %v1778_v44  ;;  %v609_v28 = vadd.f32 1.0, %v1782_v62 }
  0xc8   : > { %v570_v29 = vmul.f32 0.6931472, %v1105_v61  ;;  %v572_v5 = vmul.f32 %v980_v59, %v566_v50  ;;  %1106 = vlog2.f32 %v523_v45  ;;  %v616_v26 = vadd.f32 2.0, %v1778_v44 }
  0xc9   : > { %v549_v25 = vmul.f32 %v545_v58, %v537_v57  ;;  %v573_v54 = vmul.f32 %v981_v43, %v568_v37  ;;  %1108 = vlog2.f32 %v524_v22  ;;  %v610_v24 = vadd.f32 1.0, %v1786_v0 }
  0xca   : > { %v551_v35 = vadd.f32 0.083333336, %v547_v33  ;;  %v575_v36 = vsub.f32 %v571_v17, %v1696_v53  ;;  %1110 = vlog2.f32 %v525_v27  ;;  %v1796_v30 = vadd.f32 4.0, %v1774_v42 }
  0xcb   : > { %v550_v15 = vmul.f32 %v546_v8, %v538_v47  ;;  %v552_v14 = vadd.f32 0.083333336, %v548_v7  ;;  %1112 = vlog2.f32 %v526_v34  ;;  %v611_v21 = vmul.f32 %v607_v13, %v1774_v42 }
  0xcc   : > { %v574_v45 = vmul.f32 %v982_v32, %v570_v29  ;;  %v576_v59 = vsub.f32 %v572_v5, %v1699_v31  ;;  %v1801_v57 = vadd.f32 4.0, %v1778_v44  ;;  %v1804_v22 = vadd.f32 4.0, %v1782_v62 }
  0xcd   : > { %v553_v43 = vadd.f32 0.083333336, %v549_v25  ;;  %v577_v53 = vsub.f32 %v573_v54, %v1702_v55  ;;  %v1808_v27 = vadd.f32 4.0, %v1786_v0  ;;  %1114 = vrcp.f32 %v1796_v30 }
  0xce   : > { %v1107_v7 = vpop.eup %1106  ;;  %v555_v8 = vmul.f32 %v1722_v41, %v551_v35  ;;  %v579_v47 = vadd.f32 0.9189385, %v575_v36  ;;  %v617_v5 = vadd.f32 2.0, %v1782_v62  ;;  %1116 = vrcp.f32 %v1801_v57 }
  0xcf   : > { %v1109_v31 = vpop.eup %1108  ;;  %v554_v34 = vadd.f32 0.083333336, %v550_v15  ;;  %v612_v32 = vmul.f32 %v608_v6, %v1778_v44  ;;  %v613_v25 = vmul.f32 %v609_v28, %v1782_v62  ;;  %1118 = vrcp.f32 %v1804_v22 }
  0xd0   : > { %v1111_v54 = vpop.eup %1110  ;;  %v556_v55 = vmul.f32 %v1725_v46, %v552_v14  ;;  %v578_v50 = vsub.f32 %v574_v45, %v1706_v56  ;;  %v580_v61 = vadd.f32 0.9189385, %v576_v59  ;;  %1120 = vrcp.f32 %v1808_v27 }
  0xd1   : > { %v1113_v41 = vpop.eup %1112  ;;  %v497_v58 = vsub.f32 %v1753_v18, %v1760_v19  ;;  %v557_v37 = vmul.f32 %v1731_v48, %v553_v43  ;;  %v581_v33 = vadd.f32 0.9189385, %v577_v53  ;;  %v618_v6 = vadd.f32 2.0, %v1786_v0 }
  0xd2   : > { %v583_v17 = vadd.f32 %v579_v47, %v555_v8  ;;  %v588_v13 = vmul.f32 0.6931472, %v1107_v7  ;;  %v614_v28 = vmul.f32 %v610_v24, %v1786_v0  ;;  %1122 = vlog2.f32 %v1796_v30 }
  0xd3   : > { %v1826_v46 = vpop.eup %1114  ;;  %v558_v56 = vmul.f32 %v1740_v40, %v554_v34  ;;  %v619_v29 = vmul.f32 %v615_v23, %v611_v21  ;;  %v620_v35 = vmul.f32 %v616_v26, %v612_v32  ;;  %v621_v36 = vmul.f32 %v617_v5, %v613_v25 }
  0xd4   : > { %v1829_v15 = vpop.eup %1116  ;;  %v582_v18 = vadd.f32 0.9189385, %v578_v50  ;;  %v584_v48 = vadd.f32 %v580_v61, %v556_v55  ;;  %v590_v19 = vmul.f32 0.6931472, %v1109_v31  ;;  %v639_v14 = vmul.f32 %v1826_v46, %v1826_v46 }
  0xd5   : > { %v1833_v45 = vpop.eup %1118  ;;  %v585_v24 = vadd.f32 %v581_v33, %v557_v37  ;;  %v592_v59 = vmul.f32 0.6931472, %v1111_v54  ;;  %v623_v43 = vadd.f32 3.0, %v1774_v42  ;;  %1124 = vlog2.f32 %v1801_v57 }
  0xd6   : > { %v1837_v40 = vpop.eup %1120  ;;  %v595_v26 = vsub.f32 %v583_v17, %v588_v13  ;;  %v640_v23 = vmul.f32 %v1829_v15, %v1829_v15  ;;  %v641_v21 = vmul.f32 %v1833_v45, %v1833_v45  ;;  %1126 = vlog2.f32 %v1804_v22 }
  0xd7   : > { %v594_v53 = vmul.f32 0.6931472, %v1113_v41  ;;  %v624_v7 = vadd.f32 3.0, %v1778_v44  ;;  %v643_v8 = vmul.f32 0.0007936508, %v639_v14  ;;  %1128 = vlog2.f32 %v1808_v27 }
  0xd8   : > { %v1123_v42 = vpop.eup %1122  ;;  %v586_v47 = vadd.f32 %v582_v18, %v558_v56  ;;  %v596_v5 = vsub.f32 %v584_v48, %v590_v19  ;;  %v625_v31 = vadd.f32 3.0, %v1782_v62  ;;  %v642_v34 = vmul.f32 %v1837_v40, %v1837_v40  ;;  %v383_v18 = vld [vmem:[%s1560_s20] sm:$0xff] }
  0xd9   : > { %v498_v32 = vsub.f32 %v1758_v52, %v1762_v20  ;;  %v597_v25 = vsub.f32 %v585_v24, %v592_v59  ;;  %v622_v54 = vmul.f32 %v618_v6, %v614_v28  ;;  %v626_v55 = vadd.f32 3.0, %v1786_v0 }
  0xda   : > { %v1952_v44 = vsub.f32 %v1733_v16, %v1735_v60  ;;  %v627_v61 = vmul.f32 %v623_v43, %v619_v29  ;;  %v644_v41 = vmul.f32 0.0007936508, %v640_v23  ;;  %v645_v62 = vmul.f32 0.0007936508, %v641_v21  ;;  %v384_v29 = vld [vmem:[%s1560_s20 + $0x8] sm:$0xff] }
  0xdb   : > { %v1125_v37 = vpop.eup %1124  ;;  %v628_v33 = vmul.f32 %v624_v7, %v620_v35  ;;  %v647_v17 = vadd.f32 -0.0027777778, %v643_v8  ;;  %v983_v13 = vadd.f32 -0.5, %v1796_v30  ;;  %v668_v52 = vmul.f32 0.6931472, %v1123_v42  ;;  %v385_v8 = vld [vmem:[%s1560_s20 + $0x10] sm:$0xff] }
  0xdc   : > { %v1855_v50 = vadd.f32 %v595_v26, %v1952_v44  ;;  %v1127_v20 = vpop.eup %1126  ;;  %v598_v6 = vsub.f32 %v586_v47, %v594_v53  ;;  %v1953_v0 = vsub.f32 %v1743_v51, %v1746_v63  ;;  %v629_v16 = vmul.f32 %v625_v31, %v621_v36  ;;  %v386_v31 = vld [vmem:[%s1560_s20 + $0x18] sm:$0xff] }
  0xdd   : > { %v646_v60 = vmul.f32 0.0007936508, %v642_v34  ;;  %v1129_v56 = vpop.eup %1128  ;;  %v1865_v48 = vadd.f32 %v597_v25, %v497_v58  ;;  %v630_v35 = vmul.f32 %v626_v55, %v622_v54  ;;  %v984_v19 = vadd.f32 -0.5, %v1801_v57 }
  0xde   : > { %v1861_v28 = vadd.f32 %v596_v5, %v1953_v0  ;;  %v985_v24 = vadd.f32 -0.5, %v1804_v22  ;;  %v648_v59 = vadd.f32 -0.0027777778, %v644_v41  ;;  %v649_v43 = vadd.f32 -0.0027777778, %v645_v62 }
  0xdf   : > { %v670_v26 = vmul.f32 0.6931472, %v1125_v37  ;;  %1130 = vlog2.f32 %v627_v61  ;;  %v651_v51 = vmul.f32 %v647_v17, %v639_v14  ;;  %v672_v63 = vmul.f32 0.6931472, %v1127_v20 }
  0xe0   : > { %v675_v36 = vmul.f32 %v983_v13, %v668_v52  ;;  %1132 = vlog2.f32 %v628_v33  ;;  %v650_v53 = vadd.f32 -0.0027777778, %v646_v60  ;;  %v986_v7 = vadd.f32 -0.5, %v1808_v27 }
  0xe1   : > { %v674_v58 = vmul.f32 0.6931472, %v1129_v56  ;;  %1134 = vlog2.f32 %v629_v16  ;;  %v1871_v42 = vadd.f32 %v598_v6, %v498_v32  ;;  %v719_v47 = vadd.f32 %v1594_v9, %v383_v18 }
  0xe2   : > { %1136 = vlog2.f32 %v630_v35  ;;  %v720_v5 = vadd.f32 %v1598_v10, %v384_v29  ;;  %v652_v25 = vmul.f32 %v648_v59, %v640_v23  ;;  %v653_v54 = vmul.f32 %v649_v43, %v641_v21 }
  0xe3   : > { %v676_v14 = vmul.f32 %v984_v19, %v670_v26  ;;  %1138 = vlog2.f32 %v1594_v9  ;;  %v655_v55 = vadd.f32 0.083333336, %v651_v51  ;;  %v677_v44 = vmul.f32 %v985_v24, %v672_v63 }
  0xe4   : > { %v679_v61 = vsub.f32 %v675_v36, %v1796_v30  ;;  %1140 = vlog2.f32 %v1598_v10  ;;  %v654_v32 = vmul.f32 %v650_v53, %v642_v34  ;;  %v678_v62 = vmul.f32 %v986_v7, %v674_v58 }
  0xe5   : > { %v1131_v41 = vpop.eup %1130  ;;  %1142 = vlog2.f32 %v1602_v11  ;;  %v721_v37 = vadd.f32 %v1602_v11, %v385_v8  ;;  %v722_v23 = vadd.f32 %v1606_v12, %v386_v31  ;;  %v739_v21 = vadd.f32 1e-10, %v383_v18 }
  0xe6   : > { %v1133_v33 = vpop.eup %1132  ;;  %1144 = vlog2.f32 %v1606_v12  ;;  %v740_v9 = vadd.f32 1e-10, %v384_v29  ;;  %v656_v13 = vadd.f32 0.083333336, %v652_v25  ;;  %v657_v52 = vadd.f32 0.083333336, %v653_v54 }
  0xe7   : > { %v1135_v17 = vpop.eup %1134  ;;  %v680_v30 = vsub.f32 %v676_v14, %v1801_v57  ;;  %1146 = vlog2.f32 %v719_v47  ;;  %v659_v34 = vmul.f32 %v1826_v46, %v655_v55  ;;  %v681_v20 = vsub.f32 %v677_v44, %v1804_v22 }
  0xe8   : > { %v1137_v10 = vpop.eup %1136  ;;  %v683_v6 = vadd.f32 0.9189385, %v679_v61  ;;  %1148 = vlog2.f32 %v720_v5  ;;  %v658_v0 = vadd.f32 0.083333336, %v654_v32  ;;  %v682_v16 = vsub.f32 %v678_v62, %v1808_v27 }
  0xe9   : > { %v1139_v11 = vpop.eup %1138  ;;  %1150 = vlog2.f32 %v721_v37  ;;  %v741_v12 = vadd.f32 1e-10, %v385_v8  ;;  %v1954_v56 = vmin.f32 %v1576_v1, 1000000.0  ;;  %v1955_v57 = vmin.f32 %v1578_v2, 1000000.0 }
  0xea   : > { %v1141_v60 = vpop.eup %1140  ;;  %1152 = vlog2.f32 %v722_v23  ;;  %v742_v46 = vadd.f32 1e-10, %v386_v31  ;;  %v660_v35 = vmul.f32 %v1829_v15, %v656_v13  ;;  %v661_v19 = vmul.f32 %v1833_v45, %v657_v52 }
  0xeb   : > { %v715_v18 = vadd.f32 %v1654_v38, %v1954_v56  ;;  %v716_v29 = vadd.f32 %v1657_v39, %v1955_v57  ;;  %v1143_v22 = vpop.eup %1142  ;;  %v684_v24 = vadd.f32 0.9189385, %v680_v30  ;;  %1154 = vlog2.f32 %v739_v21 }
  0xec   : > { %v1145_v27 = vpop.eup %1144  ;;  %v685_v59 = vadd.f32 0.9189385, %v681_v20  ;;  %v687_v43 = vadd.f32 %v683_v6, %v659_v34  ;;  %v708_v26 = vmul.f32 0.6931472, %v1139_v11  ;;  %1156 = vlog2.f32 %v740_v9 }
  0xed   : > { %v1147_v1 = vpop.eup %1146  ;;  %v662_v51 = vmul.f32 %v1837_v40, %v658_v0  ;;  %v686_v2 = vadd.f32 0.9189385, %v682_v16  ;;  %v710_v63 = vmul.f32 0.6931472, %v1141_v60  ;;  %1158 = vlog2.f32 %v741_v12 }
  0xee   : > { %v1149_v36 = vpop.eup %1148  ;;  %v692_v53 = vmul.f32 0.6931472, %v1131_v41  ;;  %v712_v7 = vmul.f32 0.6931472, %v1143_v22  ;;  %v724_v58 = vmul.f32 0.6931472, %v1147_v1  ;;  %1160 = vlog2.f32 %v742_v46 }
  0xef   : > { %v1151_v15 = vpop.eup %1150  ;;  %v688_v45 = vadd.f32 %v684_v24, %v660_v35  ;;  %v694_v8 = vmul.f32 0.6931472, %v1133_v33  ;;  %v714_v47 = vmul.f32 0.6931472, %v1145_v27  ;;  %v726_v5 = vmul.f32 0.6931472, %v1149_v36 }
  0xf0   : > { %v1153_v31 = vpop.eup %1152  ;;  %v689_v25 = vadd.f32 %v685_v59, %v661_v19  ;;  %v696_v54 = vmul.f32 0.6931472, %v1135_v17  ;;  %v728_v14 = vmul.f32 0.6931472, %v1151_v15  ;;  %v731_v55 = vsub.f32 %v724_v58, %v708_v26  ;;  %v1958_v17 = vld [vmem:[#allocation10_spill] sm:$0xff] }
  0xf1   : > { %v1155_v44 = vpop.eup %1154  ;;  %v690_v40 = vadd.f32 %v686_v2, %v662_v51  ;;  %v698_v61 = vmul.f32 0.6931472, %v1137_v10  ;;  %v730_v32 = vmul.f32 0.6931472, %v1153_v31  ;;  %v732_v62 = vsub.f32 %v726_v5, %v710_v63 }
  0xf2   : > { %v1157_v37 = vpop.eup %1156  ;;  %v699_v41 = vsub.f32 %v687_v43, %v692_v53  ;;  %v1956_v23 = vmin.f32 %v1584_v3, 1000000.0  ;;  %v733_v9 = vsub.f32 %v728_v14, %v712_v7  ;;  %v744_v33 = vmul.f32 0.6931472, %v1155_v44 }
  0xf3   : > { %v1159_v13 = vpop.eup %1158  ;;  %v700_v52 = vsub.f32 %v688_v45, %v694_v8  ;;  %v1957_v30 = vmin.f32 %v1586_v4, 1000000.0  ;;  %v734_v20 = vsub.f32 %v730_v32, %v714_v47  ;;  %v746_v6 = vmul.f32 0.6931472, %v1157_v37 }
  0xf4   : > { %v717_v21 = vadd.f32 %v1667_v49, %v1956_v23  ;;  %v1161_v11 = vpop.eup %1160  ;;  %v701_v10 = vsub.f32 %v689_v25, %v696_v54  ;;  %v735_v0 = vmul.f32 %v731_v55, %v715_v18  ;;  %v748_v16 = vmul.f32 0.6931472, %v1159_v13 }
  0xf5   : > { %v718_v34 = vadd.f32 %v1958_v17, %v1957_v30  ;;  %v751_v12 = vsub.f32 %v708_v26, %v744_v33  ;;  %v702_v60 = vsub.f32 %v690_v40, %v698_v61  ;;  %v736_v56 = vmul.f32 %v732_v62, %v716_v29 }
  0xf6   : > { %v750_v3 = vmul.f32 0.6931472, %v1161_v11  ;;  %v752_v57 = vsub.f32 %v710_v63, %v746_v6  ;;  %v703_v46 = vsub.f32 %v1855_v50, %v699_v41  ;;  %v737_v22 = vmul.f32 %v733_v9, %v717_v21 }
  0xf7   : > { %v753_v35 = vsub.f32 %v712_v7, %v748_v16  ;;  %v755_v19 = vmul.f32 %v751_v12, %v1654_v38  ;;  %v704_v4 = vsub.f32 %v1861_v28, %v700_v52  ;;  %v738_v24 = vmul.f32 %v734_v20, %v718_v34 }
  0xf8   : > { %v754_v27 = vsub.f32 %v714_v47, %v750_v3  ;;  %v756_v59 = vmul.f32 %v752_v57, %v1657_v39  ;;  %v705_v18 = vsub.f32 %v1865_v48, %v701_v10  ;;  %v706_v29 = vsub.f32 %v1871_v42, %v702_v60 }
  0xf9   : > { %v757_v43 = vmul.f32 %v753_v35, %v1667_v49  ;;  %v759_v26 = vadd.f32 %v755_v19, %v735_v0 }
  0xfa   : > { %v758_v1 = vmul.f32 %v754_v27, %v1958_v17  ;;  %v760_v50 = vadd.f32 %v756_v59, %v736_v56  ;;  %775 = sbr.rel (%p988_p8) target bundleno = 261 (0x105), region = 52 }
  0xfb   : > { %v761_v51 = vadd.f32 %v757_v43, %v737_v22  ;;  %v763_v2 = vadd.f32 %v759_v26, %v703_v46 }
  0xfc   : > { %v762_v63 = vadd.f32 %v758_v1, %v738_v24  ;;  %v764_v38 = vadd.f32 %v760_v50, %v704_v4 }
  0xfd   : > { %v765_v36 = vadd.f32 %v761_v51, %v705_v18 }
  0xfe   : > { %v766_v28 = vadd.f32 %v762_v63, %v706_v29 }
  0xff   : > { %v776_v39 = vadd.f32 %v765_v36, %v763_v2  ;;  %v778_v53 = vld [vmem:[#allocation2] sm:$0xff]  ;;  %v779_v7 = vld [vmem:[#allocation2 + $0x8] sm:$0xff] }
 0x100   : > { %v777_v48 = vadd.f32 %v766_v28, %v764_v38 }
 0x101   : > { %v780_v49 = vadd.f32 %v778_v53, %v776_v39 }
 0x102   : > { %v781_v58 = vadd.f32 %v779_v7, %v777_v48 }
 0x103   : > { %782 = vst [vmem:[#allocation2] sm:$0xff] %v780_v49 }
 0x104   : > { %783 = vst [vmem:[#allocation2 + $0x8] sm:$0xff] %v781_v58 }
 0x105 PF: > { %p989_p13 = scmp.le.s32.totalorder %s1582_s19, 20 }
 0x107   : > { %786 = sbr.rel (%p989_p13) target bundleno = 284 (0x11c), region = 56 }
 0x10c   : > { %v787_v42 = vlaneseq  ;;  %v791_v15 = vstv %s1004_s9  ;;  %v802_v14 = vld [vmem:[#allocation2] sm:$0xff]  ;;  %v803_v44 = vld [vmem:[#allocation2 + $0x8] sm:$0xff] }
 0x10e   : > { %v788_v45 = vshrl.u32 %v787_v42, 7 }
 0x110   : > { %v789_v8 = vadd.s32 8, %v788_v45  ;;  %v792_v47 = vadd.s32 %v791_v15, %v788_v45 }
 0x112   : > { %v793_v5 = vadd.s32 %v791_v15, %v789_v8  ;;  %vm794_vm0 = vcmp.lt.s32.totalorder %v792_v47, 20 }
 0x113   : > { %v796_v31 = vsel %vm794_vm0, %v763_v2, 0.0  ;;  %v797_v25 = vsel %vm794_vm0, %v764_v38, 0.0 }
 0x114   : > { %vm795_vm1 = vcmp.lt.s32.totalorder %v793_v5, 20 }
 0x115   : > { %v798_v54 = vsel %vm795_vm1, %v765_v36, 0.0  ;;  %v799_v55 = vsel %vm795_vm1, %v766_v28, 0.0 }
 0x116   : > { %v800_v40 = vadd.f32 %v798_v54, %v796_v31  ;;  %v801_v61 = vadd.f32 %v799_v55, %v797_v25 }
 0x118   : > { %v804_v32 = vadd.f32 %v802_v14, %v800_v40  ;;  %v805_v62 = vadd.f32 %v803_v44, %v801_v61 }
 0x11a   : > { %806 = vst [vmem:[#allocation2] sm:$0xff] %v804_v32 }
 0x11b   : > { %807 = vst [vmem:[#allocation2 + $0x8] sm:$0xff] %v805_v62 }
 0x11c PF: > { %p991_p0 = scmp.ne.s32.totalorder %s1325_s15, 1 }
 0x11e   : > { %811 = sbr.rel (%p991_p0) target bundleno = 474 (0x1da), region = 60 }
 0x123   : > { %v812_v37 = vld [vmem:[#allocation2] sm:$0xff]  ;;  %v813_v41 = vld [vmem:[#allocation2 + $0x8] sm:$0xff] }
 0x124   : > { %v814_v23 = vadd.f32 %v813_v41, %v812_v37 }
 0x126   : > { %815 = vadd.xlane.f32.xlu0 %v814_v23 }
 0x199   : > { %v816_v21 = vpop.xlane.xlu0 %815 }
 0x19a   : > { %v817_v9 = vrot.slane %v816_v21, 4 }
 0x19c   : > { %v818_v33 = vadd.f32 %v817_v9, %v816_v21 }
 0x19e   : > { %v819_v13 = vrot.slane %v818_v33, 2 }
 0x1a0   : > { %v820_v52 = vadd.f32 %v819_v13, %v818_v33 }
 0x1a2   : > { %v821_v30 = vrot.slane %v820_v52, 1 }
 0x1a4   : > { %v822_v17 = vadd.f32 %v821_v30, %v820_v52 }
 0x1a6   : > { %1006 = vpush %v822_v17 }
 0x1d7   : > { %s1007_s23 = spop %1006 }
 0x1d8   : > { %v824_v34 = vstv %s1007_s23 }
 0x1d9   : > { %826 = vst [vmem:[%s1939_s3] sm:$0xff] %v824_v34 }
 0x1da PF: > { %s19_s17 = sadd.s32 1, %s1333_s17   ;;  %s1959_s12 = smov %s1317_s13 }
 0x1db   : > { %p16_p1 = scmp.ge.s32.totalorder %s19_s17, 4   ;;  %s1960_s13 = smov %s1321_s14 }
 0x1dc   : > { %s1961_s14 = smov %s1420_s26  ;;  %s1962_s15 = smov %s1329_s16 }
 0x1dd   : > { %s1963_s16 = smov %s1965_s18  ;;  %18 = sbr.rel (!%p16_p1) target bundleno = 6 (0x6), region = 112 }
 0x1e2   :  { %846 = vsyncpa [#allocation4], 1 }
 0x1e3   :  { %848 = vsyncpa [#allocation4 + $0x1], 1 }
 0x1e4   :  { %849 = vsyncpa [#allocation6], 1 }
 0x1e5   :  { %851 = vsyncpa [#allocation6 + $0x1], 1 }

</bundles_post_ra>
